<compile_context>
chip_gen: v7x
topology: tpu7x:2x2x1
jax: 0.10.0
libtpu: 0.0.40
codegen_flags: <defaults>
</compile_context>

<pallas_src>
import functools

import jax
import jax.numpy as jnp
from jax.experimental import pallas as pl
from jax.experimental.pallas import tpu as pltpu

_HIGHEST = jax.lax.Precision.HIGHEST


def make_hnde_kernel(beta, gamma, delta):
    """Kernel computing mechanistic LV term + MLP correction on a (3, TILE_N) tile."""
    beta = float(beta)      # compile-time constants (static jit args)
    gamma = float(gamma)
    delta = float(delta)

    def kernel(y_ref, w1_ref, b1_ref, w2_ref, b2_ref, w3_ref, b3_ref, o_ref):
        y = y_ref[...]                               # (3, TN) f32, batch on lanes
        S1 = y[0:1, :]                               # (1, TN)
        S2 = y[1:2, :]
        A = y[2:3, :]

        # ----- mechanistic Lotka-Volterra term (VPU) -----
        inter = gamma * S1 * S2                      # shared gamma*S1*S2 term
        dS1 = beta * S1 * A - inter                  # (1, TN)
        dS2 = inter - delta * S2                     # (1, TN)
        dA = jnp.zeros_like(dS1)                     # exactly zero

        # ----- MLP correction: 3 -> H1 -> tanh -> H2 -> tanh -> 1 (MXU + EUP) -----
        h = jnp.tanh(
            jnp.dot(w1_ref[...], y,
                    preferred_element_type=jnp.float32, precision=_HIGHEST)
            + b1_ref[...]
        )                                            # (H1, TN)
        h = jnp.tanh(
            jnp.dot(w2_ref[...], h,
                    preferred_element_type=jnp.float32, precision=_HIGHEST)
            + b2_ref[...]
        )                                            # (H2, TN)
        net = (
            jnp.dot(w3_ref[...], h,
                    preferred_element_type=jnp.float32, precision=_HIGHEST)
            + b3_ref[...]
        )                                            # (1, TN)

        # Single lane-dense store; net broadcasts over all 3 species (as in PyTorch).
        mech = jnp.concatenate([dS1, dS2, dA], axis=0)   # (3, TN)
        o_ref[...] = mech + net

    return kernel


def _round_up(a, m):
    return ((a + m - 1) // m) * m


def _cdiv(a, b):
    return -(-a // b)


@functools.partial(jax.jit, static_argnames=("beta", "gamma", "delta", "tile_n"))
def _hnde_pallas(yt, w1, b1c, w2, b2c, w3r, b3c, *, beta, gamma, delta, tile_n):
    """yt: (3, n_pad) lane-dense state; weights torch-style (out, in); biases columns."""
    h1 = w1.shape[0]
    h2 = w2.shape[0]
    n_pad = yt.shape[1]
    grid = (n_pad // tile_n,)

    cost = pl.CostEstimate(
        flops=int(2 * n_pad * (3 * h1 + h1 * h2 + h2) + 10 * n_pad),
        transcendentals=int(n_pad * (h1 + h2)),
        bytes_accessed=int(
            4 * 6 * n_pad
            + 4 * (w1.size + b1c.size + w2.size + b2c.size + w3r.size + b3c.size)
        ),
    )

    kernel = make_hnde_kernel(beta, gamma, delta)

    return pl.pallas_call(
        kernel,
        out_shape=jax.ShapeDtypeStruct((3, n_pad), jnp.float32),
        grid=grid,
        in_specs=[
            pl.BlockSpec((3, tile_n), lambda i: (0, i)),     # state tile (pipelined)
            pl.BlockSpec((h1, 3), lambda i: (0, 0)),         # weights: VMEM-resident
            pl.BlockSpec((h1, 1), lambda i: (0, 0)),
            pl.BlockSpec((h2, h1), lambda i: (0, 0)),
            pl.BlockSpec((h2, 1), lambda i: (0, 0)),
            pl.BlockSpec((1, h2), lambda i: (0, 0)),
            pl.BlockSpec((1, 1), lambda i: (0, 0)),
        ],
        out_specs=pl.BlockSpec((3, tile_n), lambda i: (0, i)),
        compiler_params=pltpu.CompilerParams(
            dimension_semantics=("parallel",),               # shard batch across TCs (v7x)
            vmem_limit_bytes=48 * 1024 * 1024,               # headroom for big tiles on v5e
        ),
        cost_estimate=cost,
    )(yt, w1, b1c, w2, b2c, w3r, b3c)


def known_param_hnde_forward(t, y, mlp_params, ode_params, tile_n=8192):
    """JAX wrapper mirroring KnownParam_HNDE.forward(t, y). Returns (N, 1, 3)."""
    del t  # unused, as in the PyTorch module
    beta, gamma, delta = (float(p) for p in ode_params)   # concrete outside jit
    w1, b1, w2, b2, w3, b3 = mlp_params                   # weights (out,in), biases (out,)

    h1 = w1.shape[0]
    h2 = w2.shape[0]

    y2 = jnp.asarray(y, jnp.float32).reshape(-1, 3)        # (N, 3)
    n = y2.shape[0]

    # ----- balanced, lane-dense tiling (multiple of 128), VMEM-capped -----
    tile_n = max(128, min(_round_up(int(tile_n), 128), 32768))
    grid = _cdiv(n, tile_n)
    if n > 256:
        grid = max(grid, 2)          # >=2 steps so v7x megacore splits the batch
        if grid % 2:
            grid += 1                # even step count -> balanced across 2 TCs
    tile = _round_up(_cdiv(n, grid), 128)
    n_pad = grid * tile

    # Layout plumbing: batch -> lanes; pad only when needed.
    # TODO(synk): for ODE integrators, keep the state in (3, N) lane-dense layout across
    # steps to avoid the per-call transpose/pad/slice round-trips.
    yt = y2.T                                              # (3, N)
    if n_pad != n:
        yt = jnp.pad(yt, ((0, 0), (0, n_pad - n)))         # (3, n_pad)

    w1 = w1.astype(jnp.float32)                            # (H1, 3)
    b1c = b1.reshape(h1, 1).astype(jnp.float32)            # (H1, 1)
    w2 = w2.astype(jnp.float32)                            # (H2, H1)
    b2c = b2.reshape(h2, 1).astype(jnp.float32)            # (H2, 1)
    w3r = w3.reshape(1, h2).astype(jnp.float32)            # (1, H2)
    b3c = b3.reshape(1, 1).astype(jnp.float32)             # (1, 1)

    out_t = _hnde_pallas(
        yt, w1, b1c, w2, b2c, w3r, b3c,
        beta=beta, gamma=gamma, delta=delta, tile_n=tile,
    )                                                      # (3, n_pad)

    return out_t[:, :n].T.reshape(n, 1, 3)


def init_mlp_params(key, input_dim, hidden_sizes, output_dim):
    """Deterministic init matching nn.init.normal_(std=0.1) weights, zero biases.
    Weights are torch-style (out, in); biases are (out,)."""
    dims = [input_dim] + list(hidden_sizes) + [output_dim]
    params = []
    for i in range(len(dims) - 1):
        key, sub = jax.random.split(key)
        w = 0.1 * jax.random.normal(sub, (dims[i + 1], dims[i]), dtype=jnp.float32)
        b = jnp.zeros((dims[i + 1],), dtype=jnp.float32)
        params.extend([w, b])
    return tuple(params)


def reference_forward(t, y, mlp_params, ode_params):
    """Pure-JAX reference mirroring the PyTorch forward, for validation."""
    del t
    beta, gamma, delta = ode_params
    w1, b1, w2, b2, w3, b3 = mlp_params
    y2 = jnp.asarray(y, jnp.float32).reshape(-1, 3)
    S1, S2, A = y2[:, 0], y2[:, 1], y2[:, 2]
    dS1 = beta * S1 * A - gamma * S1 * S2
    dS2 = gamma * S1 * S2 - delta * S2
    dA = 0.0 * A
    mech = jnp.stack([dS1, dS2, dA], axis=1).reshape(-1, 1, 3)
    h = jnp.tanh(jnp.dot(y2, w1.T, precision=_HIGHEST) + b1)
    h = jnp.tanh(jnp.dot(h, w2.T, precision=_HIGHEST) + b2)
    net = (jnp.dot(h, w3.T, precision=_HIGHEST) + b3).reshape(-1, 1, 1)
    return mech + net                                       # net broadcasts over species


if __name__ == "__main__":
    key = jax.random.PRNGKey(0)

    # structure = (input_dim=3, output_dim=1, hidden_sizes=[32, 32])
    hidden_sizes = [32, 32]
    mlp_params = init_mlp_params(key, 3, hidden_sizes, 1)

    # Known ODE parameters p0 = (beta, gamma, delta)
    ode_params = (1.0, 0.5, 0.8)

    # Small batch of states, shape (N, 1, 3) like the PyTorch module expects.
    key, yk = jax.random.split(key)
    y = jax.random.uniform(yk, (8, 1, 3), dtype=jnp.float32, minval=0.1, maxval=2.0)
    t = jnp.float32(0.0)

    out = known_param_hnde_forward(t, y, mlp_params, ode_params)
    out = jax.block_until_ready(out)
    ref = reference_forward(t, y, mlp_params, ode_params)
    assert out.shape == (8, 1, 3)
    assert jnp.allclose(out, ref, atol=1e-5, rtol=1e-4)

    # Exercise a multi-tile grid (padding + >1 grid steps, even split) with a small tile.
    key, yk2 = jax.random.split(key)
    y_big = jax.random.uniform(yk2, (300, 1, 3), dtype=jnp.float32, minval=0.1, maxval=2.0)
    out_big = known_param_hnde_forward(t, y_big, mlp_params, ode_params, tile_n=128)
    out_big = jax.block_until_ready(out_big)
    ref_big = reference_forward(t, y_big, mlp_params, ode_params)
    assert out_big.shape == (300, 1, 3)
    assert jnp.allclose(out_big, ref_big, atol=1e-5, rtol=1e-4)

    print("KERNEL_OK")
</pallas_src>

<mosaic_0001>
module attributes {stable_mosaic.version = 11 : i64} {
  func.func @kernel(%arg0: i32, %arg1: memref<3x128xf32, #tpu.memory_space<vmem>>, %arg2: memref<32x3xf32, #tpu.memory_space<vmem>>, %arg3: memref<32x1xf32, #tpu.memory_space<vmem>>, %arg4: memref<32x32xf32, #tpu.memory_space<vmem>>, %arg5: memref<32x1xf32, #tpu.memory_space<vmem>>, %arg6: memref<1x32xf32, #tpu.memory_space<vmem>>, %arg7: memref<1x1xf32, #tpu.memory_space<vmem>>, %arg8: memref<3x128xf32, #tpu.memory_space<vmem>>) attributes {dimension_semantics = [#tpu.dimension_semantics<parallel>], iteration_bounds = array<i64: 1>, scalar_prefetch = 0 : i64, scratch_operands = 0 : i64, tpu.core_type = #tpu.core_type<tc>, window_params = [{transform_indices = @transform_0, window_bounds = array<i64: 3, 128>}, {pipeline_mode = #tpu.pipeline_mode<synchronous>, transform_indices = @transform_1, window_bounds = array<i64: 32, 3>}, {pipeline_mode = #tpu.pipeline_mode<synchronous>, transform_indices = @transform_2, window_bounds = array<i64: 32, 1>}, {pipeline_mode = #tpu.pipeline_mode<synchronous>, transform_indices = @transform_3, window_bounds = array<i64: 32, 32>}, {pipeline_mode = #tpu.pipeline_mode<synchronous>, transform_indices = @transform_4, window_bounds = array<i64: 32, 1>}, {pipeline_mode = #tpu.pipeline_mode<synchronous>, transform_indices = @transform_5, window_bounds = array<i64: 1, 32>}, {pipeline_mode = #tpu.pipeline_mode<synchronous>, transform_indices = @transform_6, window_bounds = array<i64: 1, 1>}, {transform_indices = @transform_7, window_bounds = array<i64: 3, 128>}]} {
    %c0 = arith.constant 0 : index
    %c0_0 = arith.constant 0 : index
    %0 = vector.load %arg1[%c0, %c0_0] : memref<3x128xf32, #tpu.memory_space<vmem>>, vector<3x128xf32>
    %1 = vector.extract_strided_slice %0 {offsets = [0, 0], sizes = [1, 128], strides = [1, 1]} : vector<3x128xf32> to vector<1x128xf32>
    %2 = vector.extract_strided_slice %0 {offsets = [1, 0], sizes = [1, 128], strides = [1, 1]} : vector<3x128xf32> to vector<1x128xf32>
    %3 = vector.extract_strided_slice %0 {offsets = [2, 0], sizes = [1, 128], strides = [1, 1]} : vector<3x128xf32> to vector<1x128xf32>
    %cst = arith.constant 5.000000e-01 : f32
    %4 = vector.broadcast %cst : f32 to vector<1x128xf32>
    %5 = arith.mulf %4, %1 : vector<1x128xf32>
    %6 = arith.mulf %5, %2 : vector<1x128xf32>
    %cst_1 = arith.constant 1.000000e+00 : f32
    %7 = vector.broadcast %cst_1 : f32 to vector<1x128xf32>
    %8 = arith.mulf %7, %1 : vector<1x128xf32>
    %9 = arith.mulf %8, %3 : vector<1x128xf32>
    %10 = arith.subf %9, %6 : vector<1x128xf32>
    %cst_2 = arith.constant 8.000000e-01 : f32
    %11 = vector.broadcast %cst_2 : f32 to vector<1x128xf32>
    %12 = arith.mulf %11, %2 : vector<1x128xf32>
    %13 = arith.subf %6, %12 : vector<1x128xf32>
    %cst_3 = arith.constant 0.000000e+00 : f32
    %14 = vector.broadcast %cst_3 : f32 to vector<1x128xf32>
    %c0_4 = arith.constant 0 : index
    %c0_5 = arith.constant 0 : index
    %15 = vector.load %arg2[%c0_4, %c0_5] : memref<32x3xf32, #tpu.memory_space<vmem>>, vector<32x3xf32>
    %cst_6 = arith.constant dense<0.000000e+00> : vector<32x128xf32>
    %16 = tpu.matmul %15, %0, %cst_6 {dimension_numbers = #tpu.dot_dimension_numbers<[1], [0], [0], [1], [0, 0, 1, 1], [], []>, precision = #tpu.contract_precision<fp32>} : vector<32x3xf32>, vector<3x128xf32>, vector<32x128xf32> -> vector<32x128xf32>
    %c0_7 = arith.constant 0 : index
    %c0_8 = arith.constant 0 : index
    %17 = vector.load %arg3[%c0_7, %c0_8] : memref<32x1xf32, #tpu.memory_space<vmem>>, vector<32x1xf32>
    %18 = vector.broadcast %17 : vector<32x1xf32> to vector<32x128xf32>
    %19 = arith.addf %16, %18 : vector<32x128xf32>
    %20 = math.tanh %19 : vector<32x128xf32>
    %c0_9 = arith.constant 0 : index
    %c0_10 = arith.constant 0 : index
    %21 = vector.load %arg4[%c0_9, %c0_10] : memref<32x32xf32, #tpu.memory_space<vmem>>, vector<32x32xf32>
    %cst_11 = arith.constant dense<0.000000e+00> : vector<32x128xf32>
    %22 = tpu.matmul %21, %20, %cst_11 {dimension_numbers = #tpu.dot_dimension_numbers<[1], [0], [0], [1], [0, 0, 1, 1], [], []>, precision = #tpu.contract_precision<fp32>} : vector<32x32xf32>, vector<32x128xf32>, vector<32x128xf32> -> vector<32x128xf32>
    %c0_12 = arith.constant 0 : index
    %c0_13 = arith.constant 0 : index
    %23 = vector.load %arg5[%c0_12, %c0_13] : memref<32x1xf32, #tpu.memory_space<vmem>>, vector<32x1xf32>
    %24 = vector.broadcast %23 : vector<32x1xf32> to vector<32x128xf32>
    %25 = arith.addf %22, %24 : vector<32x128xf32>
    %26 = math.tanh %25 : vector<32x128xf32>
    %c0_14 = arith.constant 0 : index
    %c0_15 = arith.constant 0 : index
    %27 = vector.load %arg6[%c0_14, %c0_15] : memref<1x32xf32, #tpu.memory_space<vmem>>, vector<1x32xf32>
    %cst_16 = arith.constant dense<0.000000e+00> : vector<1x128xf32>
    %28 = tpu.matmul %27, %26, %cst_16 {dimension_numbers = #tpu.dot_dimension_numbers<[1], [0], [0], [1], [0, 0, 1, 1], [], []>, precision = #tpu.contract_precision<fp32>} : vector<1x32xf32>, vector<32x128xf32>, vector<1x128xf32> -> vector<1x128xf32>
    %c0_17 = arith.constant 0 : index
    %c0_18 = arith.constant 0 : index
    %29 = vector.load %arg7[%c0_17, %c0_18] : memref<1x1xf32, #tpu.memory_space<vmem>>, vector<1x1xf32>
    %30 = vector.broadcast %29 : vector<1x1xf32> to vector<1x128xf32>
    %31 = arith.addf %28, %30 : vector<1x128xf32>
    %32 = tpu.concatenate %10, %13, %14 in 0 : vector<1x128xf32>, vector<1x128xf32>, vector<1x128xf32> -> vector<3x128xf32>
    %33 = vector.broadcast %31 : vector<1x128xf32> to vector<3x128xf32>
    %34 = arith.addf %32, %33 : vector<3x128xf32>
    %c0_19 = arith.constant 0 : index
    %c0_20 = arith.constant 0 : index
    %35 = vector.load %arg8[%c0_19, %c0_20] : memref<3x128xf32, #tpu.memory_space<vmem>>, vector<3x128xf32>
    tpu.vector_store %arg8[%c0_19, %c0_20], %34 {strides = array<i32>} : memref<3x128xf32, #tpu.memory_space<vmem>>, vector<3x128xf32>,
    return
  }
  func.func @transform_0(%arg0: i32) -> (i32, i32) {
    %c0_i32 = arith.constant 0 : i32
    %c0_i32_0 = arith.constant 0 : i32
    return %c0_i32, %arg0 : i32, i32
  }
  func.func @transform_1(%arg0: i32) -> (i32, i32) {
    %c0_i32 = arith.constant 0 : i32
    %c0_i32_0 = arith.constant 0 : i32
    %c0_i32_1 = arith.constant 0 : i32
    return %c0_i32, %c0_i32_0 : i32, i32
  }
  func.func @transform_2(%arg0: i32) -> (i32, i32) {
    %c0_i32 = arith.constant 0 : i32
    %c0_i32_0 = arith.constant 0 : i32
    %c0_i32_1 = arith.constant 0 : i32
    return %c0_i32, %c0_i32_0 : i32, i32
  }
  func.func @transform_3(%arg0: i32) -> (i32, i32) {
    %c0_i32 = arith.constant 0 : i32
    %c0_i32_0 = arith.constant 0 : i32
    %c0_i32_1 = arith.constant 0 : i32
    return %c0_i32, %c0_i32_0 : i32, i32
  }
  func.func @transform_4(%arg0: i32) -> (i32, i32) {
    %c0_i32 = arith.constant 0 : i32
    %c0_i32_0 = arith.constant 0 : i32
    %c0_i32_1 = arith.constant 0 : i32
    return %c0_i32, %c0_i32_0 : i32, i32
  }
  func.func @transform_5(%arg0: i32) -> (i32, i32) {
    %c0_i32 = arith.constant 0 : i32
    %c0_i32_0 = arith.constant 0 : i32
    %c0_i32_1 = arith.constant 0 : i32
    return %c0_i32, %c0_i32_0 : i32, i32
  }
  func.func @transform_6(%arg0: i32) -> (i32, i32) {
    %c0_i32 = arith.constant 0 : i32
    %c0_i32_0 = arith.constant 0 : i32
    %c0_i32_1 = arith.constant 0 : i32
    return %c0_i32, %c0_i32_0 : i32, i32
  }
  func.func @transform_7(%arg0: i32) -> (i32, i32) {
    %c0_i32 = arith.constant 0 : i32
    %c0_i32_0 = arith.constant 0 : i32
    return %c0_i32, %arg0 : i32, i32
  }
}

</mosaic_0001>

<bundles_post_ra>
// kernel: _hnde_pallas.1
= control target key start
LH: loop header
LB: loop body
LE: loop exit
PB: predicated region body
PF: predicated region fallthrough
CT: control target
= control target key end

     0   :  { %s2605_s0 = inlined_call_operand.vmem [shape: f32[3,128], index: 0, kind: input, shape index: {}]   ;;  %s2606_s1 = inlined_call_operand.vmem [shape: f32[32,3], index: 1, kind: input, shape index: {}]   ;;  %s2607_s2 = inlined_call_operand.vmem [shape: f32[32,1], index: 2, kind: input, shape index: {}]   ;;  %s2608_s3 = inlined_call_operand.vmem [shape: f32[32,32], index: 3, kind: input, shape index: {}]   ;;  %s2609_s4 = inlined_call_operand.vmem [shape: f32[32,1], index: 4, kind: input, shape index: {}]   ;;  %s2610_s5 = inlined_call_operand.vmem [shape: f32[1,32], index: 5, kind: input, shape index: {}]   ;;  %s2611_s6 = inlined_call_operand.<no memory space> [shape: f32[1,1], index: 6, kind: input, shape index: {}]   ;;  %s2612_s7 = inlined_call_operand.hbm [shape: f32[3,128], index: 7, kind: output, shape index: {}]  }
   0x1   :  { %v12_v0 = vstv %s2611_s6 }
   0x2   :  { %13 = vst [vmem:[#allocation2] sm:$0x1] %v12_v0 }
   0x3   :  { %v2398_v1 = vld [vmem:[%s2605_s0] sm:$0x7]  ;;  %vm85_vm0 = vcmask 1042432   ;;  %vm72_vm1 = vcmask 23552   ;;  %v45_v3 = vld [vmem:[%s2606_s1 + $0x8] sm:$0xff]  ;;  %v46_v7 = vld [vmem:[%s2606_s1 + $0x10] sm:$0xff] }
   0x4   :  { %v44_v2 = vld [vmem:[%s2606_s1] sm:$0xff]  ;;  %v86_v4 = vsel %vm85_vm0, %v2398_v1, 0  ;;  %v77_v6 = vsel %vm72_vm1, %v45_v3, 0  ;;  %v47_v8 = vld [vmem:[%s2606_s1 + $0x18] sm:$0xff]  ;;  %v80_v12 = vsel %vm72_vm1, %v46_v7, 0  ;;  %v2347_v13 = vmov 0  }
   0x5   :  { %v74_v5 = vsel %vm72_vm1, %v44_v2, 0  ;;  %v2415_v9 = vand.u32 4294901760, %v86_v4  ;;  %v2419_v11 = vand.u32 4294901760, %v77_v6  ;;  %2305 = vset.pattern.permute.xlu0 %v2347_v13  ;;  %v48_v14 = vld [vmem:[%s2607_s2] sm:$0xff]  ;;  %2306 = vset.pattern.permute.xlu1 %v2347_v13  ;;  %v2425_v15 = vand.u32 4294901760, %v80_v12  ;;  %v50_v17 = vld [vmem:[%s2607_s2 + $0x10] sm:$0xff] }
   0x6   :  { %v2417_v10 = vand.u32 4294901760, %v74_v5  ;;  %v83_v16 = vsel %vm72_vm1, %v47_v8, 0  ;;  %54 = vperm.xlu0 %2305, %v48_v14   ;;  %v49_v22 = vld [vmem:[%s2607_s2 + $0x8] sm:$0xff]  ;;  %64 = vperm.xlu1 %2306, %v50_v17  }
   0x7   :  { %v196_v18 = vsub.f32 %v86_v4, %v2415_v9  ;;  %v165_v20 = vsub.f32 %v77_v6, %v2419_v11  ;;  %1960 = vmatprep.subr.mxu1 %v2415_v9  ;;  %v2435_v21 = vand.u32 4294901760, %v83_v16  ;;  %v175_v23 = vsub.f32 %v80_v12, %v2425_v15 }
   0x8   :  { %v155_v19 = vsub.f32 %v74_v5, %v2417_v10  ;;  %1961 = vmatpush3.msra.mxu1 %v2415_v9 }
   0x9   :  { %14 = vsyncpa [#allocation4], 0  ;;  %1976 = vmatprep.subr.mxu0 %v196_v18  ;;  %v185_v25 = vsub.f32 %v83_v16, %v2435_v21  ;;  %v166_v26 = vand.u32 4294901760, %v165_v20  ;;  %v197_v27 = vand.u32 4294901760, %v196_v18  ;;  %v176_v28 = vand.u32 4294901760, %v175_v23  ;;  %v51_v29 = vld [vmem:[%s2607_s2 + $0x18] sm:$0xff] }
   0xa   :  { %1978 = vmatprep.mubr.f32.mxu0 %v155_v19  ;;  %v156_v24 = vand.u32 4294901760, %v155_v19  ;;  %1977 = vmatpush3.msra.mxu0 %v196_v18  ;;  %v671_v34 = vld [vmem:[%s2609_s4] sm:$0xff]  ;;  %v673_v41 = vld [vmem:[%s2609_s4 + $0x10] sm:$0xff]  ;;  %v672_v43 = vld [vmem:[%s2609_s4 + $0x8] sm:$0xff]  ;;  %vm695_vm2 = vcmask 261120   ;;  %vm2349_vm3 = vmmov 0  }
   0xb   :  { %59 = vperm.xlu0 %2305, %v49_v22   ;;  %1979 = vmatmul.mubr.f32.vlgmr.msra.gmra.mrb[0].mxu0 %v165_v20  ;;  %v167_v31 = vsub.f32 %v165_v20, %v166_v26  ;;  %v186_v32 = vand.u32 4294901760, %v185_v25  ;;  %v198_v33 = vsub.f32 %v196_v18, %v197_v27  ;;  %v177_v35 = vsub.f32 %v175_v23, %v176_v28  ;;  %v1327_v44 = vld [vmem:[#allocation2] sm:$0x1]  ;;  %v674_v45 = vld [vmem:[%s2609_s4 + $0x18] sm:$0xff]  ;;  %v668_v63 = vld [vmem:[%s2608_s3 + $0x8] sm:$0xff] }
   0xc   :  { %1984 = vmatprep.subr.mxu0 %v2415_v9  ;;  %v157_v30 = vsub.f32 %v155_v19, %v156_v24  ;;  %1981 = vmatprep.mubr.f32.mxu0 %v175_v23  ;;  %v667_v46 = vld [vmem:[%s2608_s3] sm:$0xff]  ;;  %v669_v5 = vld [vmem:[%s2608_s3 + $0x10] sm:$0xff]  ;;  %v700_v7 = vsel %vm695_vm2, %v668_v63, 0  ;;  %v670_v13 = vld [vmem:[%s2608_s3 + $0x18] sm:$0xff]  ;;  %vm1828_vm4 = vcmask 1040384   ;;  %vm1830_vm5 = vcmask 1041408  }
   0xd   :  { %1985 = vmatpush3.msra.mxu0 %v2415_v9  ;;  %v168_v37 = vand.u32 4294901760, %v167_v31  ;;  %v187_v38 = vsub.f32 %v185_v25, %v186_v32  ;;  %v199_v39 = vand.u32 4294901760, %v198_v33  ;;  %69 = vperm.xlu1 %2306, %v51_v29   ;;  %v178_v40 = vand.u32 4294901760, %v177_v35 }
   0xe   :  { %v158_v36 = vand.u32 4294901760, %v157_v30  ;;  %1992 = vmatprep.subr.mxu0 %v197_v27  ;;  %v697_v47 = vsel %vm695_vm2, %v667_v46, 0  ;;  %v703_v12 = vsel %vm695_vm2, %v669_v5, 0  ;;  %v706_v17 = vsel %vm695_vm2, %v670_v13, 0  ;;  %v1326_v5 = vld [vmem:[%s2610_s5] sm:$0x1] }
   0xf   :  { %677 = vperm.xlu0 %2305, %v671_v34   ;;  %1982 = vmatmul.mubr.f32.gmra.mrb[2].mxu0 %v185_v25  ;;  %v188_v42 = vand.u32 4294901760, %v187_v38  ;;  %v2478_v48 = vand.u32 4294901760, %v697_v47  ;;  %v2500_v16 = vand.u32 4294901760, %v703_v12  ;;  %v2506_v19 = vand.u32 4294901760, %v706_v17  ;;  %s2351_s5 = smov [#allocation3]  }
  0x10   :  { %1962 = vmatprep.mubr.f32.mxu1 %v158_v36  ;;  %1986 = vmatprep.mubr.f32.mxu0 %v156_v24  ;;  %s1844_s9 = sshll.u32 %s2351_s5, 4  ;;  %s1845_s9 = int_to_ptr.vmem [resolvable:$true] %s1844_s9 }
  0x11   :  { %1963 = vmatmul.mubr.f32.vlgmr.msra.gmra.mrb[0].mxu1 %v168_v37  ;;  %1968 = vmatprep.subr.mxu1 %v199_v39  ;;  %v2481_v49 = vsub.f32 %v697_v47, %v2478_v48  ;;  %v2509_v20 = vsub.f32 %v703_v12, %v2500_v16  ;;  %s2323_s0 = scalar_lea.vmem %s1845_s9, 64  ;;  %p2328_p1 = scmp.lt.s32.totalorder %s1845_s9, %s1845_s9 }
  0x12   :  { %1965 = vmatprep.mubr.f32.mxu1 %v178_v40  ;;  %1969 = vmatpush3.msra.mxu1 %v199_v39  ;;  %p2324_p0 = scmp.ne.s32.totalorder %s1845_s9, %s2323_s0  ;;  %p2329_p2 = scmp.lt.s32.totalorder %s2323_s0, %s2323_s0 }
  0x13   :  { %687 = vperm.xlu0 %2305, %v673_v41   ;;  %1987 = vmatmul.mubr.f32.vlgmr.msra.gmra.mrb[0].mxu0 %v166_v26  ;;  %v779_v50 = vand.u32 4294901760, %v2481_v49  ;;  %v2513_v26 = vsub.f32 %v706_v17, %v2506_v19 }
  0x14   :  { %682 = vperm.xlu1 %2306, %v672_v43   ;;  %1993 = vmatpush3.msra.mxu0 %v197_v27  ;;  %p2330_p3 = por %p2329_p2, %p2328_p1 }
  0x15   :  { %1966 = vmatmul.mubr.f32.gmra.mrb[2].mxu1 %v188_v42  ;;  %1989 = vmatprep.mubr.f32.mxu0 %v176_v28  ;;  %v780_v51 = vsub.f32 %v2481_v49, %v779_v50  ;;  %v799_v28 = vand.u32 4294901760, %v2509_v20  ;;  %v809_v38 = vand.u32 4294901760, %v2513_v26 }
  0x16   :  { %1970 = vmatprep.mubr.f32.mxu1 %v2417_v10  ;;  %2000 = vmatprep.subr.mxu0 %v2415_v9  ;;  %p2331_p4 = pnand %p2330_p3, %p2324_p0 }
  0x17   :  { %1330 = vperm.xlu0 %2305, %v1327_v44   ;;  %1990 = vmatmul.mubr.f32.gmra.mrb[2].mxu0 %v186_v32  ;;  %v781_v52 = vand.u32 4294901760, %v780_v51  ;;  %v800_v41 = vsub.f32 %v2509_v20, %v799_v28 }
  0x18   :  { %692 = vperm.xlu1 %2306, %v674_v45   ;;  %1994 = vmatprep.mubr.f32.mxu0 %v2417_v10 }
  0x19   :  { %1971 = vmatmul.mubr.f32.vlgmr.msra.gmra.mrb[0].mxu1 %v2419_v11 }
  0x1a   :  { %1973 = vmatprep.mubr.f32.mxu1 %v2425_v15 }
  0x1b   :  { %1995 = vmatmul.mubr.f32.vlgmr.msra.gmra.mrb[0].mxu0 %v2419_v11 }
  0x1c   :  { %2001 = vmatpush3.msra.mxu0 %v2415_v9  ;;  %1997 = vmatprep.mubr.f32.mxu0 %v2425_v15 }
  0x1d   :  { %1974 = vmatmul.mubr.f32.gmra.mrb[2].mxu1 %v2435_v21 }
  0x1e   :  { %2016 = vmatprep.mubr.f32.mxu1 %v781_v52 }
  0x1f   :  { %1998 = vmatmul.mubr.f32.gmra.mrb[2].mxu0 %v2435_v21 }
  0x20   :  { %2002 = vmatprep.mubr.f32.mxu0 %v2417_v10 }
  0x23   :  { %2003 = vmatmul.mubr.f32.vlgmr.msra.gmra.mrb[0].mxu0 %v2419_v11 }
  0x24   :  { %2005 = vmatprep.mubr.f32.mxu0 %v2425_v15  ;;  %v2498_v15 = vand.u32 4294901760, %v700_v7 }
  0x26   :  { %v2504_v18 = vsub.f32 %v700_v7, %v2498_v15 }
  0x27   :  { %2006 = vmatmul.mubr.f32.gmra.mrb[2].mxu0 %v2435_v21 }
  0x28   :  { %v789_v24 = vand.u32 4294901760, %v2504_v18 }
  0x2a   :  { %v790_v34 = vsub.f32 %v2504_v18, %v789_v24 }
  0x2c   :  { %v791_v47 = vand.u32 4294901760, %v790_v34 }
  0x85   :  { %v55_v55 = vpop.permute.xlu0 %54  ;;  %v65_v58 = vpop.permute.xlu1 %64 }
  0x8a   :  { %v60_v59 = vpop.permute.xlu0 %59 }
  0x8c   :  { %v70_v3 = vpop.permute.xlu1 %69 }
  0xec   :  { %v1972_v53 = vpop.f32.mrb[0].mxu1 }
  0xed   :  { %v266_v54 = vpop.f32.mrb[1].mxu1  ;;  %v2242_v60 = vadd.f32 %v1972_v53, %v60_v59 }
  0xee   :  { %v2244_v61 = vadd.f32 %v266_v54, %v55_v55  ;;  %v810_v54 = vsub.f32 %v2513_v26, %v809_v38 }
  0xf0   :  { %v1975_v56 = vpop.f32.mrb[2].mxu1  ;;  %v811_v63 = vand.u32 4294901760, %v810_v54 }
  0xf1   :  { %v278_v57 = vpop.f32.mrb[3].mxu1  ;;  %v2246_v6 = vadd.f32 %v1975_v56, %v70_v3  ;;  %v678_v3 = vpop.permute.xlu0 %677 }
  0xf2   :  { %v2248_v8 = vadd.f32 %v278_v57, %v65_v58  ;;  %v801_v57 = vand.u32 4294901760, %v800_v41 }
  0xf5   :  { %v688_v12 = vpop.permute.xlu0 %687 }
  0xf6   :  { %v2004_v62 = vpop.f32.mrb[0].mxu0 }
  0xf7   :  { %v2243_v0 = vadd.f32 %v2242_v60, %v2004_v62  ;;  %v641_v2 = vpop.f32.mrb[1].mxu0 }
  0xf8   :  { %v2245_v4 = vadd.f32 %v2244_v61, %v641_v2 }
  0xf9   :  { %2307 = vtanh.f32 %v2243_v0 }
  0xfa   :  { %2309 = vtanh.f32 %v2245_v4  ;;  %v2007_v9 = vpop.f32.mrb[2].mxu0 }
  0xfb   :  { %v2247_v10 = vadd.f32 %v2246_v6, %v2007_v9  ;;  %v653_v11 = vpop.f32.mrb[3].mxu0  ;;  %v1338_v9 = vsel %vm695_vm2, %v1326_v5, 0 }
  0xfc   :  { %v2249_v14 = vadd.f32 %v2248_v8, %v653_v11 }
  0xfd   :  { %2311 = vtanh.f32 %v2247_v10 }
  0xfe   :  { %2313 = vtanh.f32 %v2249_v14 }
 0x103   :  { %v2308_v21 = vpop.eup %2307 }
 0x104   :  { %v2310_v22 = vpop.eup %2309  ;;  %v712_v23 = vand.u32 4294901760, %v2308_v21 }
 0x105   :  { %v709_v25 = vand.u32 4294901760, %v2310_v22 }
 0x106   :  { %v826_v27 = vsub.f32 %v2308_v21, %v712_v23 }
 0x107   :  { %v2312_v29 = vpop.eup %2311  ;;  %v2516_v30 = vpack.c.bf16 %v712_v23, %v709_v25  ;;  %v819_v31 = vsub.f32 %v2310_v22, %v709_v25 }
 0x108   :  { %v2314_v32 = vpop.eup %2313  ;;  %v718_v33 = vand.u32 4294901760, %v2312_v29  ;;  %v827_v35 = vand.u32 4294901760, %v826_v27 }
 0x109   :  { %v715_v36 = vand.u32 4294901760, %v2314_v32  ;;  %2159 = vmatprep.subr.bf16.mxu1 %v2516_v30  ;;  %v820_v37 = vand.u32 4294901760, %v819_v31  ;;  %v2174_v39 = vpack.c.bf16 %v826_v27, %v819_v31 }
 0x10a   :  { %2161 = vmatpush3.bf16.msra.mxu1 %v2516_v30  ;;  %v828_v40 = vsub.f32 %v826_v27, %v827_v35  ;;  %v840_v42 = vsub.f32 %v2312_v29, %v718_v33 }
 0x10b   :  { %v2162_v43 = vpack.c.bf16 %v718_v33, %v715_v36  ;;  %v821_v44 = vsub.f32 %v819_v31, %v820_v37  ;;  %v833_v45 = vsub.f32 %v2314_v32, %v715_v36  ;;  %v2190_v46 = vpack.c.bf16 %v827_v35, %v820_v37 }
 0x10c   :  { %v829_v51 = vand.u32 4294901760, %v828_v40  ;;  %v841_v52 = vand.u32 4294901760, %v840_v42 }
 0x10d   :  { %2163 = vmatprep.subr.bf16.mxu1 %v2162_v43  ;;  %v822_v53 = vand.u32 4294901760, %v821_v44  ;;  %v834_v55 = vand.u32 4294901760, %v833_v45  ;;  %v2178_v56 = vpack.c.bf16 %v840_v42, %v833_v45 }
 0x10e   :  { %2165 = vmatpush3.bf16.msra.mxu1 %v2162_v43  ;;  %v842_v58 = vsub.f32 %v840_v42, %v841_v52 }
 0x10f   :  { %v2166_v59 = vpack.c.bf16 %v829_v51, %v822_v53  ;;  %v835_v60 = vsub.f32 %v833_v45, %v834_v55  ;;  %v2194_v61 = vpack.c.bf16 %v841_v52, %v834_v55 }
 0x110   :  { %v843_v62 = vand.u32 4294901760, %v842_v58  ;;  %v30_v58 = vmul.f32 0.5, %v2398_v1 }
 0x111   :  { %2017 = vmatmul.mubr.f32.vlgmr.msra.gmra.mrb[4].mxu1 %v791_v47  ;;  %2167 = vmatprep.subr.bf16.mxu1 %v2166_v59  ;;  %v836_v0 = vand.u32 4294901760, %v835_v60  ;;  %v39_v60 = vmul.f32 0.8, %v2398_v1 }
 0x112   :  { %2169 = vmatpush3.bf16.msra.mxu1 %v2166_v59  ;;  %2019 = vmatprep.mubr.f32.mxu1 %v801_v57  ;;  %v32_v59 = vrot.slane %v2398_v1, 1 }
 0x113   :  { %v2170_v2 = vpack.c.bf16 %v843_v62, %v836_v0  ;;  %v41_v0 = vrot.slane %v39_v60, 1 }
 0x114   :  { %v34_v62 = vmul.f32 %v32_v59, %v30_v58 }
 0x115   :  { %2020 = vmatmul.mubr.f32.gmra.mrb[6].mxu1 %v811_v63  ;;  %2171 = vmatprep.subr.bf16.mxu1 %v2170_v2  ;;  %v35_v63 = vrot.slane %v2398_v1, 2 }
 0x116   :  { %2173 = vmatpush3.bf16.msra.mxu1 %v2170_v2  ;;  %2030 = vmatprep.mubr.f32.mxu1 %v2478_v48 }
 0x117   :  { %2175 = vmatprep.subr.bf16.mxu1 %v2174_v39 }
 0x119   :  { %2031 = vmatmul.mubr.f32.vlgmr.msra.gmra.mrb[4].mxu1 %v2498_v15 }
 0x11a   :  { %2177 = vmatpush3.bf16.msra.mxu1 %v2174_v39  ;;  %2033 = vmatprep.mubr.f32.mxu1 %v2500_v16 }
 0x11b   :  { %2179 = vmatprep.subr.bf16.mxu1 %v2178_v56 }
 0x11d   :  { %2034 = vmatmul.mubr.f32.gmra.mrb[6].mxu1 %v2506_v19 }
 0x11e   :  { %2181 = vmatpush3.bf16.msra.mxu1 %v2178_v56  ;;  %2044 = vmatprep.mubr.f32.mxu1 %v2481_v49  ;;  %v2348_v49 = vmov 0.0|0.0  }
 0x11f   :  { %2183 = vmatprep.subr.bf16.mxu1 %v2516_v30  ;;  %2212 = vmatprep.subr.bf16.mxu0 %v2348_v49 }
 0x121   :  { %2045 = vmatmul.mubr.f32.vlgmr.msra.gmra.mrb[4].mxu1 %v2504_v18 }
 0x122   :  { %2185 = vmatpush3.bf16.msra.mxu1 %v2516_v30  ;;  %2047 = vmatprep.mubr.f32.mxu1 %v2509_v20 }
 0x123   :  { %2187 = vmatprep.subr.bf16.mxu1 %v2162_v43 }
 0x125   :  { %2048 = vmatmul.mubr.f32.gmra.mrb[6].mxu1 %v2513_v26 }
 0x126   :  { %2189 = vmatpush3.bf16.msra.mxu1 %v2162_v43  ;;  %2058 = vmatprep.mubr.f32.mxu1 %v779_v50  ;;  %v2350_v50 = vmov 0.0  }
 0x127   :  { %2191 = vmatprep.subr.bf16.mxu1 %v2190_v46  ;;  %2111 = vmatprep.mubr.msk.f32.mxu0 %vm2349_vm3, %v2350_v50 }
 0x129   :  { %2059 = vmatmul.mubr.f32.vlgmr.msra.gmra.mrb[4].mxu1 %v789_v24 }
 0x12a   :  { %2193 = vmatpush3.bf16.msra.mxu1 %v2190_v46  ;;  %2061 = vmatprep.mubr.f32.mxu1 %v799_v28 }
 0x12b   :  { %2195 = vmatprep.subr.bf16.mxu1 %v2194_v61 }
 0x12d   :  { %2062 = vmatmul.mubr.f32.gmra.mrb[6].mxu1 %v809_v38 }
 0x12e   :  { %2197 = vmatpush3.bf16.msra.mxu1 %v2194_v61  ;;  %2072 = vmatprep.mubr.f32.mxu1 %v2478_v48  ;;  %v1333_v61 = vlaneseq }
 0x12f   :  { %2199 = vmatprep.subr.bf16.mxu1 %v2516_v30 }
 0x130   :  { %v1334_v2 = vshrl.u32 %v1333_v61, 7 }
 0x131   :  { %2073 = vmatmul.mubr.f32.vlgmr.msra.gmra.mrb[4].mxu1 %v2498_v15 }
 0x132   :  { %2201 = vmatpush3.bf16.msra.mxu1 %v2516_v30  ;;  %2075 = vmatprep.mubr.f32.mxu1 %v2500_v16 }
 0x133   :  { %2203 = vmatprep.subr.bf16.mxu1 %v2162_v43 }
 0x135   :  { %2076 = vmatmul.mubr.f32.gmra.mrb[6].mxu1 %v2506_v19 }
 0x136   :  { %2205 = vmatpush3.bf16.msra.mxu1 %v2162_v43  ;;  %2086 = vmatprep.mubr.f32.mxu1 %v2478_v48  ;;  %v683_v48 = vpop.permute.xlu1 %682 }
 0x137   :  { %2206 = vmatprep.subr.bf16.mxu1 %v2348_v49 }
 0x139   :  { %2087 = vmatmul.mubr.f32.vlgmr.msra.gmra.mrb[4].mxu1 %v2498_v15 }
 0x13a   :  { %2089 = vmatprep.mubr.f32.mxu1 %v2500_v16  ;;  %v693_v10 = vpop.permute.xlu1 %692  ;;  %v2564_v16 = vand.u32 4294901760, %v1338_v9 }
 0x13c   :  { %v1410_v17 = vsub.f32 %v1338_v9, %v2564_v16 }
 0x13d   :  { %2090 = vmatmul.mubr.f32.gmra.mrb[6].mxu1 %v2506_v19 }
 0x13e   :  { %2100 = vmatprep.mubr.msk.f32.mxu1 %vm2349_vm3, %v2350_v50  ;;  %v1411_v21 = vand.u32 4294901760, %v1410_v17 }
 0x140   :  { %v1412_v29 = vsub.f32 %v1410_v17, %v1411_v21 }
 0x142   :  { %v1413_v40 = vand.u32 4294901760, %v1412_v29 }
 0x20c   :  { %v2088_v4 = vpop.f32.mrb[4].mxu1 }
 0x20d   :  { %v2250_v6 = vadd.f32 %v2088_v4, %v683_v48  ;;  %v1300_v7 = vpop.f32.mrb[5].mxu1  ;;  %v1335_v48 = vsub.s32 0, %v1334_v2 }
 0x20e   :  { %v2251_v8 = vadd.f32 %v1300_v7, %v678_v3  ;;  %v1331_v3 = vpop.permute.xlu0 %1330 }
 0x20f   :  { %2315 = vtanh.f32 %v2250_v6  ;;  %v1336_v6 = vrot.slane %v1331_v3, %v1335_v48 }
 0x210   :  { %2317 = vtanh.f32 %v2251_v8  ;;  %v2091_v11 = vpop.f32.mrb[6].mxu1 }
 0x211   :  { %v2252_v13 = vadd.f32 %v2091_v11, %v693_v10  ;;  %v1312_v14 = vpop.f32.mrb[7].mxu1 }
 0x212   :  { %v2253_v15 = vadd.f32 %v1312_v14, %v688_v12 }
 0x213   :  { %2319 = vtanh.f32 %v2252_v13 }
 0x214   :  { %2321 = vtanh.f32 %v2253_v15 }
 0x219   :  { %v2316_v18 = vpop.eup %2315 }
 0x21a   :  { %v2318_v19 = vpop.eup %2317  ;;  %v1344_v20 = vand.u32 4294901760, %v2316_v18 }
 0x21b   :  { %v1341_v22 = vand.u32 4294901760, %v2318_v19 }
 0x21c   :  { %v1428_v23 = vsub.f32 %v2316_v18, %v1344_v20 }
 0x21d   :  { %v2320_v24 = vpop.eup %2319  ;;  %v2207_v25 = vpack.c.bf16 %v1344_v20, %v1341_v22  ;;  %v1421_v26 = vsub.f32 %v2318_v19, %v1341_v22 }
 0x21e   :  { %v2322_v27 = vpop.eup %2321  ;;  %v1350_v28 = vand.u32 4294901760, %v2320_v24  ;;  %v1429_v30 = vand.u32 4294901760, %v1428_v23 }
 0x21f   :  { %2208 = vmatpush3.bf16.msra.mxu1 %v2207_v25  ;;  %v1347_v31 = vand.u32 4294901760, %v2322_v27  ;;  %v1422_v32 = vand.u32 4294901760, %v1421_v26  ;;  %v2219_v33 = vpack.c.bf16 %v1428_v23, %v1421_v26 }
 0x220   :  { %2209 = vmatprep.subr.bf16.mxu1 %v2348_v49  ;;  %v1442_v34 = vsub.f32 %v2320_v24, %v1350_v28  ;;  %v1430_v35 = vsub.f32 %v1428_v23, %v1429_v30 }
 0x221   :  { %v2210_v36 = vpack.c.bf16 %v1350_v28, %v1347_v31  ;;  %v1435_v37 = vsub.f32 %v2322_v27, %v1347_v31  ;;  %v1423_v38 = vsub.f32 %v1421_v26, %v1422_v32  ;;  %v2231_v39 = vpack.c.bf16 %v1429_v30, %v1422_v32 }
 0x222   :  { %v1431_v41 = vand.u32 4294901760, %v1430_v35  ;;  %v1443_v42 = vand.u32 4294901760, %v1442_v34 }
 0x223   :  { %2211 = vmatpush3.bf16.msra.mxu1 %v2210_v36  ;;  %v1424_v43 = vand.u32 4294901760, %v1423_v38  ;;  %v1436_v44 = vand.u32 4294901760, %v1435_v37  ;;  %v2222_v45 = vpack.c.bf16 %v1442_v34, %v1435_v37 }
 0x224   :  { %v1444_v46 = vsub.f32 %v1442_v34, %v1443_v42 }
 0x225   :  { %v2213_v47 = vpack.c.bf16 %v1431_v41, %v1424_v43  ;;  %v1437_v51 = vsub.f32 %v1435_v37, %v1436_v44  ;;  %v2234_v52 = vpack.c.bf16 %v1443_v42, %v1436_v44 }
 0x226   :  { %2101 = vmatmul.mubr.f32.vlgmr.msra.gmra.mrb[8].mxu1 %v1413_v40  ;;  %v1445_v53 = vand.u32 4294901760, %v1444_v46 }
 0x227   :  { %2214 = vmatpush3.bf16.msra.mxu0 %v2213_v47  ;;  %v1438_v54 = vand.u32 4294901760, %v1437_v51 }
 0x228   :  { %2215 = vmatprep.subr.bf16.mxu0 %v2348_v49 }
 0x229   :  { %v2216_v55 = vpack.c.bf16 %v1445_v53, %v1438_v54 }
 0x22b   :  { %2217 = vmatpush3.bf16.msra.mxu0 %v2216_v55 }
 0x22c   :  { %2218 = vmatprep.subr.bf16.mxu0 %v2348_v49 }
 0x22e   :  { %2112 = vmatmul.mubr.f32.vlgmr.msra.gmra.mrb[4].mxu0 %v2564_v16 }
 0x22f   :  { %2220 = vmatpush3.bf16.msra.mxu0 %v2219_v33  ;;  %2122 = vmatprep.mubr.msk.f32.mxu0 %vm2349_vm3, %v2350_v50 }
 0x230   :  { %2221 = vmatprep.subr.bf16.mxu0 %v2348_v49 }
 0x233   :  { %2223 = vmatpush3.bf16.msra.mxu0 %v2222_v45 }
 0x234   :  { %2224 = vmatprep.subr.bf16.mxu0 %v2348_v49 }
 0x236   :  { %2123 = vmatmul.mubr.f32.vlgmr.msra.gmra.mrb[4].mxu0 %v1410_v17 }
 0x237   :  { %2226 = vmatpush3.bf16.msra.mxu0 %v2207_v25  ;;  %2133 = vmatprep.mubr.msk.f32.mxu0 %vm2349_vm3, %v2350_v50 }
 0x238   :  { %2227 = vmatprep.subr.bf16.mxu0 %v2348_v49 }
 0x23b   :  { %2229 = vmatpush3.bf16.msra.mxu0 %v2210_v36 }
 0x23c   :  { %2230 = vmatprep.subr.bf16.mxu0 %v2348_v49 }
 0x23e   :  { %2134 = vmatmul.mubr.f32.vlgmr.msra.gmra.mrb[4].mxu0 %v1411_v21 }
 0x23f   :  { %2232 = vmatpush3.bf16.msra.mxu0 %v2231_v39  ;;  %2144 = vmatprep.mubr.msk.f32.mxu0 %vm2349_vm3, %v2350_v50 }
 0x240   :  { %2233 = vmatprep.subr.bf16.mxu0 %v2348_v49 }
 0x243   :  { %2235 = vmatpush3.bf16.msra.mxu0 %v2234_v52 }
 0x244   :  { %2236 = vmatprep.subr.bf16.mxu0 %v2348_v49 }
 0x246   :  { %2145 = vmatmul.mubr.f32.vlgmr.msra.gmra.mrb[4].mxu0 %v2564_v16 }
 0x247   :  { %2238 = vmatpush3.bf16.msra.mxu0 %v2207_v25  ;;  %2155 = vmatprep.mubr.msk.f32.mxu0 %vm2349_vm3, %v2350_v50  ;;  %v37_v50 = vmul.f32 %v35_v63, %v2398_v1 }
 0x248   :  { %2239 = vmatprep.subr.bf16.mxu0 %v2348_v49  ;;  %v43_v49 = vsub.f32 %v34_v62, %v41_v0 }
 0x249   :  { %v38_v4 = vsub.f32 %v37_v50, %v34_v62 }
 0x24a   :  { %v1826_v5 = vrot.slane %v43_v49, 7 }
 0x24b   :  { %2241 = vmatpush3.bf16.msra.mxu0 %v2210_v36 }
 0x24c   :  { %v1829_v8 = vsel %vm1828_vm4, %v38_v4, %v1826_v5 }
 0x24d   :  { %v1831_v12 = vsel %vm1830_vm5, %v1829_v8, 0.0 }
 0x24e   :  { %2156 = vmatmul.mubr.f32.vlgmr.msra.gmra.mrb[4].mxu0 %v2564_v16 }
 0x2f9   :  { %v1415_v56 = vpop.f32.mrb[8].mxu1 }
 0x2fa   :  { %v2102_v57 = vpop.f32.mrb[9].mxu1  ;;  %v1416_v7 = vadd.f32 %v1415_v56, %v1336_v6 }
 0x321   :  { %v1821_v9 = vpop.f32.mrb[4].mxu0 }
 0x322   :  { %v2255_v10 = vadd.f32 %v1821_v9, %v1416_v7  ;;  %v2157_v11 = vpop.f32.mrb[5].mxu0 }
 0x324   :  { %v1835_v13 = vrot.slane %v2255_v10, %v1335_v48 }
 0x326   :  { %v1836_v14 = vadd.f32 %v1835_v13, %v1831_v12 }
 0x328   :  { %1837 = vst [vmem:[#allocation3] sm:$0x7] %v1836_v14 }
 0x329   :  { %2334 = shalt.err (!%p2331_p4)
}
 0x32a   :  { %s2335_s12 = scalar_lea.hbm %s2612_s7, 64 }
 0x32b   :  { %p2336_p5 = scmp.ne.s32.totalorder %s2612_s7, %s2335_s12  ;;  %p2339_p6 = scmp.lt.u32.totalorder %s2335_s12, %s2612_s7 }
 0x32d   :  { %p2341_p7 = pnand %p2339_p6, %p2336_p5 }
 0x32f   :  { %2344 = shalt.err (!%p2341_p7)
}
 0x330   :  { %1847 = dma.vmem_to_hbm [thread:$0]  %s1845_s9, 64, %s2612_s7, [#allocation4]  }
 0x331   :  { %2345 = dma.done.wait [#allocation4], 64  }
 0x332   :  { %2346 = vsyncadd [#allocation4], 4294967232 }
 0x333   :  { %1851 = vsyncpa [#allocation4], 1 }

</bundles_post_ra>
